<compile_context>
chip_gen: v7x
topology: tpu7x:2x2x1
jax: 0.10.0
libtpu: 0.0.40
codegen_flags: <defaults>
</compile_context>

<pallas_src>
import functools

import jax
import jax.numpy as jnp
from jax.experimental import pallas as pl
from jax.experimental.pallas import tpu as pltpu


def _round_up(x, n):
    return ((x + n - 1) // n) * n


def _mcp_kernel(x_ref, wt_ref, invx_ref, invw_ref, label_ref, out_ref, *, s, m, tc):
    """Writes one (tb, tc) tile of  s * (cos(x, W) - one_hot(label) * m)."""
    # MXU: x (tb, D) @ W^T (D, tc) in NN form, operands in their native dtype,
    # f32 accumulation.
    ip = jax.lax.dot_general(
        x_ref[...], wt_ref[...],
        dimension_numbers=(((1,), (0,)), ((), ())),
        preferred_element_type=jnp.float32)                       # (tb, tc)

    # s * cosine via two broadcast multiplies; both inverse norms are hoisted
    # to the wrapper (s is folded into inv_x), so there is no per-tile
    # squaring or XLU reduction under the MXU.
    scaled = ip * invx_ref[...] * invw_ref[...]                    # (tb, tc)

    # One-hot margin: (1, tc) global column ids vs. (tb, 1) labels, broadcast
    # compare + select (padded rows carry label -1 and never match).
    col0 = pl.program_id(0) * tc          # C is the OUTER grid axis
    col_ids = col0 + jax.lax.broadcasted_iota(jnp.int32, (1, tc), 1)
    out = jnp.where(col_ids == label_ref[...], scaled - s * m, scaled)
    out_ref[...] = out.astype(out_ref.dtype)


def margin_cosine_product(inputs, weight, label, *, s=30.0, m=0.4, eps=1e-8,
                          matmul_dtype=None):
    """inputs: (B, D), weight: (C, D), label: (B,) int.  Returns (B, C).

    matmul_dtype: optionally cast the matmul operands (e.g. jnp.bfloat16) to
    halve W HBM traffic; norms / epilogue stay f32 either way.
    """
    B, D = inputs.shape
    C, D2 = weight.shape
    assert D == D2

    op_dtype = jnp.dtype(matmul_dtype) if matmul_dtype is not None else jnp.dtype(inputs.dtype)
    out_dtype = inputs.dtype
    out_bytes = jnp.dtype(out_dtype).itemsize

    # ---- tile sizes --------------------------------------------------------
    # Dtype-aware sublane multiple: 8 (f32), 16 (bf16), 32 (int8/fp8).
    sub = max(8, 32 // op_dtype.itemsize)
    if B >= 256:
        tb = 256                      # fills the 256-wide MXU on v6e / v7x
    elif B >= 128:
        tb = 128
    else:
        tb = _round_up(B, sub)
    B_pad = _round_up(B, tb)

    # Pad C only to lane granularity (128); tc is the largest of {512,256,128}
    # dividing C_pad, so there is never a big (C_pad, D) weight copy.
    C_pad = _round_up(C, 128)
    tc = 512 if C_pad % 512 == 0 else (256 if C_pad % 256 == 0 else 128)

    # Cap the double-buffered per-step VMEM footprint (~40 MiB) so the
    # pipeline stays double-buffered even on v7x's 64 MiB VMEM.
    def footprint(tb_, tc_):
        return 2 * (tb_ * D * op_dtype.itemsize       # x tile
                    + D * tc_ * op_dtype.itemsize     # W^T tile
                    + tb_ * tc_ * out_bytes           # out tile
                    + (2 * tb_ + tc_) * 4)            # inv_x, label, inv_w

    VMEM_BUDGET = 40 * 1024 * 1024
    while tc > 128 and footprint(tb, tc) > VMEM_BUDGET:
        tc //= 2
    while tb > 128 and footprint(tb, tc) > VMEM_BUDGET:
        tb //= 2
        B_pad = _round_up(B, tb)
    # TODO(synk): for very large D (>~4K f32) add a K grid axis ("arbitrary")
    # with an f32 VMEM accumulator instead of keeping D fully resident.

    # ---- hoisted inverse norms (tiny O(B*D) / O(C*D) passes) ---------------
    x32 = inputs.astype(jnp.float32)
    inv_x = s * jax.lax.rsqrt(
        jnp.maximum(jnp.sum(x32 * x32, axis=1, keepdims=True), eps))   # (B, 1)
    w32 = weight.astype(jnp.float32)
    inv_w = jax.lax.rsqrt(
        jnp.maximum(jnp.sum(w32 * w32, axis=1), eps)).reshape(1, C)    # (1, C)

    # ---- pad / lay out operands --------------------------------------------
    x_p = inputs.astype(op_dtype)
    if B_pad != B:
        x_p = jnp.pad(x_p, ((0, B_pad - B), (0, 0)))
        inv_x = jnp.pad(inv_x, ((0, B_pad - B), (0, 0)))
    # W fed pre-transposed (D, C): NN matmul, no per-tile transpose in-kernel.
    w_t = weight.astype(op_dtype).T
    if C_pad != C:
        w_t = jnp.pad(w_t, ((0, 0), (0, C_pad - C)))
        inv_w = jnp.pad(inv_w, ((0, 0), (0, C_pad - C)))   # padded cols -> 0, sliced off
    lab2d = jnp.pad(label.astype(jnp.int32), (0, B_pad - B),
                    constant_values=-1).reshape(B_pad, 1)

    grid = (C_pad // tc, B_pad // tb)   # C OUTER: each W tile is DMA'd once
    kernel = functools.partial(_mcp_kernel, s=float(s), m=float(m), tc=tc)

    out = pl.pallas_call(
        kernel,
        out_shape=jax.ShapeDtypeStruct((B_pad, C_pad), out_dtype),
        grid=grid,
        in_specs=[
            pl.BlockSpec((tb, D), lambda c, b: (b, 0)),    # x tile (re-streamed, small)
            pl.BlockSpec((D, tc), lambda c, b: (0, c)),    # W^T tile (read once)
            pl.BlockSpec((tb, 1), lambda c, b: (b, 0)),    # s * 1/||x|| per row
            pl.BlockSpec((1, tc), lambda c, b: (0, c)),    # 1/||w|| per class
            pl.BlockSpec((tb, 1), lambda c, b: (b, 0)),    # labels per row
        ],
        out_specs=pl.BlockSpec((tb, tc), lambda c, b: (b, c)),
        compiler_params=pltpu.CompilerParams(
            # C-outer "parallel": on v7x the two TensorCores split the class
            # axis, partitioning (not duplicating) W's HBM traffic.  B inner
            # axis is a plain serial loop.
            dimension_semantics=("parallel", "arbitrary"),
            # v5e's scoped-VMEM default is only 16 MiB; raise it explicitly.
            vmem_limit_bytes=64 * 1024 * 1024),
    )(x_p, w_t, inv_x.astype(jnp.float32), inv_w.astype(jnp.float32), lab2d)

    return out[:B, :C]


def _reference(inputs, weight, label, s=30.0, m=0.4, eps=1e-8):
    ip = inputs @ weight.T
    w1 = jnp.linalg.norm(inputs, axis=1)
    w2 = jnp.linalg.norm(weight, axis=1)
    cosine = ip / jnp.maximum(jnp.outer(w1, w2), eps)
    one_hot = jax.nn.one_hot(label, weight.shape[0], dtype=cosine.dtype)
    return s * (cosine - one_hot * m)


if __name__ == "__main__":
    key = jax.random.PRNGKey(0)
    k_x, k_w, k_l = jax.random.split(key, 3)

    batch = 8
    in_features = 32
    out_features = 16

    inputs = jax.random.normal(k_x, (batch, in_features), dtype=jnp.float32)

    # Deterministic xavier_uniform_-style init for the weight.
    bound = (6.0 / (in_features + out_features)) ** 0.5
    weight = jax.random.uniform(
        k_w, (out_features, in_features), dtype=jnp.float32,
        minval=-bound, maxval=bound)

    label = jax.random.randint(k_l, (batch,), 0, out_features, dtype=jnp.int32)

    out = margin_cosine_product(inputs, weight, label, s=30.0, m=0.4)
    out = jax.block_until_ready(out)

    ref = _reference(inputs, weight, label, s=30.0, m=0.4)
    assert out.shape == (batch, out_features)
    assert jnp.allclose(out, ref, atol=1e-4, rtol=1e-4), "mismatch vs reference"

    print("KERNEL_OK")
</pallas_src>

<mosaic_0001>
module attributes {stable_mosaic.version = 11 : i64} {
  func.func @_mcp_kernel(%arg0: i32, %arg1: i32, %arg2: memref<8x32xf32, #tpu.memory_space<vmem>>, %arg3: memref<32x128xf32, #tpu.memory_space<vmem>>, %arg4: memref<8x1xf32, #tpu.memory_space<vmem>>, %arg5: memref<1x128xf32, #tpu.memory_space<vmem>>, %arg6: memref<8x1xi32, #tpu.memory_space<vmem>>, %arg7: memref<8x128xf32, #tpu.memory_space<vmem>>) attributes {dimension_semantics = [#tpu.dimension_semantics<parallel>, #tpu.dimension_semantics<arbitrary>], iteration_bounds = array<i64: 1, 1>, scalar_prefetch = 0 : i64, scratch_operands = 0 : i64, tpu.core_type = #tpu.core_type<tc>, window_params = [{transform_indices = @transform_0, window_bounds = array<i64: 8, 32>}, {transform_indices = @transform_1, window_bounds = array<i64: 32, 128>}, {transform_indices = @transform_2, window_bounds = array<i64: 8, 1>}, {transform_indices = @transform_3, window_bounds = array<i64: 1, 128>}, {transform_indices = @transform_4, window_bounds = array<i64: 8, 1>}, {transform_indices = @transform_5, window_bounds = array<i64: 8, 128>}]} {
    %c0 = arith.constant 0 : index
    %c0_0 = arith.constant 0 : index
    %0 = vector.load %arg2[%c0, %c0_0] : memref<8x32xf32, #tpu.memory_space<vmem>>, vector<8x32xf32>
    %c0_1 = arith.constant 0 : index
    %c0_2 = arith.constant 0 : index
    %1 = vector.load %arg3[%c0_1, %c0_2] : memref<32x128xf32, #tpu.memory_space<vmem>>, vector<32x128xf32>
    %cst = arith.constant dense<0.000000e+00> : vector<8x128xf32>
    %2 = tpu.matmul %0, %1, %cst {dimension_numbers = #tpu.dot_dimension_numbers<[1], [0], [0], [1], [0, 0, 1, 1], [], []>} : vector<8x32xf32>, vector<32x128xf32>, vector<8x128xf32> -> vector<8x128xf32>
    %c0_3 = arith.constant 0 : index
    %c0_4 = arith.constant 0 : index
    %3 = vector.load %arg4[%c0_3, %c0_4] : memref<8x1xf32, #tpu.memory_space<vmem>>, vector<8x1xf32>
    %4 = vector.broadcast %3 : vector<8x1xf32> to vector<8x128xf32>
    %5 = arith.mulf %2, %4 : vector<8x128xf32>
    %c0_5 = arith.constant 0 : index
    %c0_6 = arith.constant 0 : index
    %6 = vector.load %arg5[%c0_5, %c0_6] : memref<1x128xf32, #tpu.memory_space<vmem>>, vector<1x128xf32>
    %7 = vector.broadcast %6 : vector<1x128xf32> to vector<8x128xf32>
    %8 = arith.mulf %5, %7 : vector<8x128xf32>
    %c128_i32 = arith.constant 128 : i32
    %9 = arith.muli %arg0, %c128_i32 : i32
    %10 = tpu.iota {dimensions = array<i32: 1>} : vector<1x128xi32>
    %11 = vector.broadcast %9 : i32 to vector<1x128xi32>
    %12 = arith.addi %11, %10 : vector<1x128xi32>
    %c0_7 = arith.constant 0 : index
    %c0_8 = arith.constant 0 : index
    %13 = vector.load %arg6[%c0_7, %c0_8] : memref<8x1xi32, #tpu.memory_space<vmem>>, vector<8x1xi32>
    %14 = vector.broadcast %12 : vector<1x128xi32> to vector<8x128xi32>
    %15 = vector.broadcast %13 : vector<8x1xi32> to vector<8x128xi32>
    %16 = arith.cmpi eq, %14, %15 : vector<8x128xi32>
    %cst_9 = arith.constant 1.200000e+01 : f32
    %17 = vector.broadcast %cst_9 : f32 to vector<8x128xf32>
    %18 = arith.subf %8, %17 : vector<8x128xf32>
    %19 = arith.select %16, %18, %8 : vector<8x128xi1>, vector<8x128xf32>
    %c0_10 = arith.constant 0 : index
    %c0_11 = arith.constant 0 : index
    %20 = vector.load %arg7[%c0_10, %c0_11] : memref<8x128xf32, #tpu.memory_space<vmem>>, vector<8x128xf32>
    tpu.vector_store %arg7[%c0_10, %c0_11], %19 {strides = array<i32>} : memref<8x128xf32, #tpu.memory_space<vmem>>, vector<8x128xf32>,
    return
  }
  func.func @transform_0(%arg0: i32, %arg1: i32) -> (i32, i32) {
    %c0_i32 = arith.constant 0 : i32
    %c0_i32_0 = arith.constant 0 : i32
    return %arg1, %c0_i32 : i32, i32
  }
  func.func @transform_1(%arg0: i32, %arg1: i32) -> (i32, i32) {
    %c0_i32 = arith.constant 0 : i32
    %c0_i32_0 = arith.constant 0 : i32
    return %c0_i32, %arg0 : i32, i32
  }
  func.func @transform_2(%arg0: i32, %arg1: i32) -> (i32, i32) {
    %c0_i32 = arith.constant 0 : i32
    %c0_i32_0 = arith.constant 0 : i32
    return %arg1, %c0_i32 : i32, i32
  }
  func.func @transform_3(%arg0: i32, %arg1: i32) -> (i32, i32) {
    %c0_i32 = arith.constant 0 : i32
    %c0_i32_0 = arith.constant 0 : i32
    return %c0_i32, %arg0 : i32, i32
  }
  func.func @transform_4(%arg0: i32, %arg1: i32) -> (i32, i32) {
    %c0_i32 = arith.constant 0 : i32
    %c0_i32_0 = arith.constant 0 : i32
    return %arg1, %c0_i32 : i32, i32
  }
  func.func @transform_5(%arg0: i32, %arg1: i32) -> (i32, i32) {
    %c0_i32 = arith.constant 0 : i32
    return %arg1, %arg0 : i32, i32
  }
}

</mosaic_0001>

<bundles_post_ra>
// kernel: tpu_custom_call.1
= control target key start
LH: loop header
LB: loop body
LE: loop exit
PB: predicated region body
PF: predicated region fallthrough
CT: control target
= control target key end

     0   :  { %10 = vsyncpa [#allocation3], 0  ;;  %s497_s0 = inlined_call_operand.hbm [shape: f32[8,32], index: 0, kind: input, shape index: {}]   ;;  %s498_s1 = inlined_call_operand.hbm [shape: f32[32,128], index: 1, kind: input, shape index: {}]   ;;  %s499_s2 = inlined_call_operand.hbm [shape: f32[8,1], index: 2, kind: input, shape index: {}]   ;;  %s500_s3 = inlined_call_operand.hbm [shape: f32[1,128], index: 3, kind: input, shape index: {}]   ;;  %s501_s4 = inlined_call_operand.hbm [shape: s32[8,1], index: 4, kind: input, shape index: {}]   ;;  %s502_s5 = inlined_call_operand.hbm [shape: f32[8,128], index: 5, kind: output, shape index: {}]  }
   0x1   :  { %11 = vsyncpa [#allocation6], 0 }
   0x2   :  { %12 = vsyncpa [#allocation9], 0 }
   0x3   :  { %13 = vsyncpa [#allocation4], 0  ;;  %s383_s18 = smov [#allocation5]   ;;  %s243_s22 = scalar_lea.hbm %s498_s1, 512 }
   0x4   :  { %s29_s19 = sshll.u32 %s383_s18, 4  ;;  %p244_p0 = scmp.ne.s32.totalorder %s498_s1, %s243_s22  ;;  %s30_s19 = int_to_ptr.vmem [resolvable:$true] %s29_s19 }
   0x5   :  { %p247_p1 = scmp.lt.u32.totalorder %s243_s22, %s498_s1 }
   0x7   :  { %p249_p2 = pnand %p247_p1, %p244_p0 }
   0x9   :  { %252 = shalt.err (!%p249_p2)
}
   0xa   :  { %s253_s27 = scalar_lea.vmem %s30_s19, 512  ;;  %p258_p4 = scmp.lt.s32.totalorder %s30_s19, %s30_s19 }
   0xb   :  { %p254_p3 = scmp.ne.s32.totalorder %s30_s19, %s253_s27  ;;  %p259_p5 = scmp.lt.s32.totalorder %s253_s27, %s253_s27 }
   0xd   :  { %p260_p6 = por %p259_p5, %p258_p4 }
   0xf   :  { %p261_p7 = pnand %p260_p6, %p254_p3 }
  0x11   :  { %264 = shalt.err (!%p261_p7)
}
  0x12   :  { %s384_s28 = smov 128   ;;  %s385_s29 = smov 8  }
  0x13   :  { %35 = dma.hbm_to_vmem [thread:$0]  %s498_s1, 512, %s30_s19, [#allocation6], %s384_s28, %s384_s28, %s385_s29  }
  0x14   :  { %s386_s7 = smov [#allocation8]   ;;  %s387_s9 = smov [#allocation2]  }
  0x15   :  { %s52_s8 = sshll.u32 %s386_s7, 4  ;;  %s20_s10 = sshll.u32 %s387_s9, 4  ;;  %s53_s8 = int_to_ptr.vmem [resolvable:$true] %s52_s8  ;;  %s21_s10 = int_to_ptr.vmem [resolvable:$true] %s20_s10 }
  0x16   :  { %s265_s13 = scalar_lea.hbm %s500_s3, 16 }
  0x17   :  { %p266_p8 = scmp.ne.s32.totalorder %s500_s3, %s265_s13  ;;  %p269_p9 = scmp.lt.u32.totalorder %s265_s13, %s500_s3 }
  0x19   :  { %p271_p10 = pnand %p269_p9, %p266_p8 }
  0x1b   :  { %274 = shalt.err (!%p271_p10)
}
  0x1c   :  { %s275_s1 = scalar_lea.vmem %s53_s8, 16  ;;  %s279_s18 = scalar_lea.vmem %s53_s8, 32 }
  0x1d   :  { %p276_p11 = scmp.ne.s32.totalorder %s53_s8, %s275_s1  ;;  %p280_p12 = scmp.lt.s32.totalorder %s53_s8, %s53_s8 }
  0x1e   :  { %p281_p13 = scmp.lt.s32.totalorder %s279_s18, %s275_s1 }
  0x20   :  { %p282_p0 = por %p281_p13, %p280_p12 }
  0x22   :  { %p283_p1 = pnand %p282_p0, %p276_p11 }
  0x24   :  { %286 = shalt.err (!%p283_p1)
}
  0x25   :  { %55 = dma.hbm_to_vmem [thread:$0]  %s500_s3, 16, %s53_s8, [#allocation9]  }
  0x26   :  { %s287_s23 = scalar_lea.hbm %s497_s0, 128 }
  0x27   :  { %p288_p2 = scmp.ne.s32.totalorder %s497_s0, %s287_s23  ;;  %p291_p3 = scmp.lt.u32.totalorder %s287_s23, %s497_s0 }
  0x29   :  { %p293_p4 = pnand %p291_p3, %p288_p2 }
  0x2b   :  { %296 = shalt.err (!%p293_p4)
}
  0x2c   :  { %s297_s28 = scalar_lea.vmem %s21_s10, 128  ;;  %p302_p6 = scmp.lt.s32.totalorder %s21_s10, %s21_s10 }
  0x2d   :  { %p298_p5 = scmp.ne.s32.totalorder %s21_s10, %s297_s28  ;;  %p303_p7 = scmp.lt.s32.totalorder %s297_s28, %s297_s28 }
  0x2f   :  { %p304_p8 = por %p303_p7, %p302_p6 }
  0x31   :  { %p305_p9 = pnand %p304_p8, %p298_p5 }
  0x33   :  { %308 = shalt.err (!%p305_p9)
}
  0x34   :  { %23 = dma.hbm_to_vmem [thread:$0]  %s497_s0, 128, %s21_s10, [#allocation3]  }
  0x35   :  { %s388_s30 = smov [#allocation7]   ;;  %s389_s7 = smov [#allocation10]  }
  0x36   :  { %s42_s6 = sshll.u32 %s388_s30, 4  ;;  %s62_s8 = sshll.u32 %s389_s7, 4  ;;  %s43_s6 = int_to_ptr.vmem [resolvable:$true] %s42_s6  ;;  %s63_s8 = int_to_ptr.vmem [resolvable:$true] %s62_s8 }
  0x37   :  { %s309_s12 = scalar_lea.hbm %s499_s2, 128 }
  0x38   :  { %p310_p10 = scmp.ne.s32.totalorder %s499_s2, %s309_s12  ;;  %p313_p11 = scmp.lt.u32.totalorder %s309_s12, %s499_s2 }
  0x3a   :  { %p315_p12 = pnand %p313_p11, %p310_p10 }
  0x3c   :  { %318 = shalt.err (!%p315_p12)
}
  0x3d   :  { %s319_s0 = scalar_lea.vmem %s43_s6, 128  ;;  %p324_p0 = scmp.lt.s32.totalorder %s43_s6, %s43_s6 }
  0x3e   :  { %p320_p13 = scmp.ne.s32.totalorder %s43_s6, %s319_s0  ;;  %p325_p1 = scmp.lt.s32.totalorder %s319_s0, %s319_s0 }
  0x40   :  { %p326_p2 = por %p325_p1, %p324_p0 }
  0x42   :  { %p327_p3 = pnand %p326_p2, %p320_p13 }
  0x44   :  { %330 = shalt.err (!%p327_p3)
}
  0x45   :  { %45 = dma.hbm_to_vmem [thread:$0]  %s499_s2, 128, %s43_s6, [#allocation6]  }
  0x46   :  { %s331_s19 = scalar_lea.hbm %s501_s4, 128 }
  0x47   :  { %p332_p4 = scmp.ne.s32.totalorder %s501_s4, %s331_s19  ;;  %p335_p5 = scmp.lt.u32.totalorder %s331_s19, %s501_s4 }
  0x49   :  { %p337_p6 = pnand %p335_p5, %p332_p4 }
  0x4b   :  { %340 = shalt.err (!%p337_p6)
}
  0x4c   :  { %s341_s24 = scalar_lea.vmem %s63_s8, 128  ;;  %p346_p8 = scmp.lt.s32.totalorder %s63_s8, %s63_s8 }
  0x4d   :  { %p342_p7 = scmp.ne.s32.totalorder %s63_s8, %s341_s24  ;;  %p347_p9 = scmp.lt.s32.totalorder %s341_s24, %s341_s24 }
  0x4f   :  { %p348_p10 = por %p347_p9, %p346_p8 }
  0x51   :  { %p349_p11 = pnand %p348_p10, %p342_p7 }
  0x53   :  { %352 = shalt.err (!%p349_p11)
}
  0x54   :  { %65 = dma.hbm_to_vmem [thread:$0]  %s501_s4, 128, %s63_s8, [#allocation9]  }
  0x55   :  { %375 = dma.done.wait [#allocation3], 128  }
  0x56   :  { %376 = vsyncadd [#allocation3], 4294967168 }
  0x57   :  { %377 = dma.done.wait [#allocation6], 640  }
  0x58   :  { %378 = vsyncadd [#allocation6], 4294966656 }
  0x59   :  { %379 = dma.done.wait [#allocation9], 144  }
  0x5a   :  { %380 = vsyncadd [#allocation9], 4294967152  ;;  %v390_v0 = vmov 0.0|0.0   ;;  %vm391_vm0 = vmmov 0   ;;  %v392_v1 = vmov 0.0   ;;  %v393_v2 = vmov 0  }
  0x5b   :  { %224 = vmatprep.subr.bf16.mxu0 %v390_v0  ;;  %221 = vmatprep.mubr.msk.f32.mxu0 %vm391_vm0, %v392_v1  ;;  %v82_v3 = vld [vmem:[#allocation5] sm:$0xff]  ;;  %v83_v4 = vld [vmem:[#allocation5 + $0x8] sm:$0xff]  ;;  %v84_v5 = vld [vmem:[#allocation5 + $0x10] sm:$0xff]  ;;  %vm86_vm1 = vcmask 261120   ;;  %v176_v13 = vlaneseq  ;;  %s394_s4 = smov [#allocation11]  }
  0x5c   :  { %242 = vset.pattern.permute.xlu0 %v393_v2  ;;  %v225_v6 = vpack.c.bf16 %v83_v4, %v82_v3  ;;  %v85_v7 = vld [vmem:[#allocation5 + $0x18] sm:$0xff]  ;;  %v160_v8 = vld [vmem:[#allocation7] sm:$0xff]  ;;  %v180_v10 = vld [vmem:[#allocation10] sm:$0xff]  ;;  %s194_s26 = sshll.u32 %s394_s4, 4  ;;  %s195_s26 = int_to_ptr.vmem [resolvable:$true] %s194_s26 }
  0x5d   :  { %163 = vperm.xlu0 %242, %v160_v8   ;;  %v228_v9 = vpack.c.bf16 %v85_v7, %v84_v5  ;;  %v81_v11 = vld [vmem:[#allocation2] sm:$0xff]  ;;  %v206_v15 = vld [vmem:[#allocation8] ss:$0 sm:$0xff]  ;;  %v177_v18 = vand.u32 127, %v176_v13  ;;  %s353_s27 = scalar_lea.vmem %s195_s26, 128  ;;  %p358_p13 = scmp.lt.s32.totalorder %s195_s26, %s195_s26 }
  0x5e   :  { %226 = vmatpush3.bf16.msra.mxu0 %v225_v6  ;;  %p354_p12 = scmp.ne.s32.totalorder %s195_s26, %s353_s27  ;;  %p359_p0 = scmp.lt.s32.totalorder %s353_s27, %s353_s27 }
  0x5f   :  { %227 = vmatprep.subr.bf16.mxu0 %v390_v0 }
  0x60   :  { %p360_p1 = por %p359_p0, %p358_p13 }
  0x61   :  { %182 = vperm.xlu0 %242, %v180_v10  }
  0x62   :  { %229 = vmatpush3.bf16.msra.mxu0 %v228_v9  ;;  %p361_p2 = pnand %p360_p1, %p354_p12 }
  0x65   :  { %222 = vmatmul.mubr.msk.f32.vlgmr.msra.gmra.mrb[0].mxu0 %vm86_vm1, %v81_v11 }
  0xdc   :  { %v164_v12 = vpop.permute.xlu0 %163 }
  0xe0   :  { %v183_v19 = vpop.permute.xlu0 %182 }
  0xe1   :  { %vm184_vm2 = vcmp.eq.s32.totalorder %v177_v18, %v183_v19 }
 0x138   :  { %v156_v14 = vpop.f32.mrb[0].mxu0 }
 0x139   :  { %v166_v16 = vmul.f32 %v164_v12, %v156_v14  ;;  %v223_v17 = vpop.f32.mrb[1].mxu0 }
 0x13b   :  { %v174_v20 = vmul.f32 %v206_v15, %v166_v16 }
 0x13d   :  { %v207_v21 = vadd.f32 -12.0, %v174_v20 }
 0x13f   :  { %v186_v22 = vsel %vm184_vm2, %v207_v21, %v174_v20 }
 0x140   :  { %187 = vst [vmem:[#allocation11] sm:$0xff] %v186_v22 }
 0x141   :  { %364 = shalt.err (!%p361_p2)
}
 0x142   :  { %s365_s29 = scalar_lea.hbm %s502_s5, 128 }
 0x143   :  { %p366_p3 = scmp.ne.s32.totalorder %s502_s5, %s365_s29  ;;  %p369_p4 = scmp.lt.u32.totalorder %s365_s29, %s502_s5 }
 0x145   :  { %p371_p5 = pnand %p369_p4, %p366_p3 }
 0x147   :  { %374 = shalt.err (!%p371_p5)
}
 0x148   :  { %197 = dma.vmem_to_hbm [thread:$0]  %s195_s26, 128, %s502_s5, [#allocation4]  }
 0x149   :  { %381 = dma.done.wait [#allocation4], 128  }
 0x14a   :  { %382 = vsyncadd [#allocation4], 4294967168 }
 0x14b   :  { %201 = vsyncpa [#allocation3], 1 }
 0x14c   :  { %202 = vsyncpa [#allocation6], 1 }
 0x14d   :  { %203 = vsyncpa [#allocation9], 1 }
 0x14e   :  { %204 = vsyncpa [#allocation4], 1 }

</bundles_post_ra>
